<compile_context>
chip_gen: v6e
topology: v6e:2x2x1
jax: 0.10.0
libtpu: 0.0.40
codegen_flags: <defaults>
</compile_context>

<pallas_src>
import functools

import jax
import jax.numpy as jnp
import numpy as np
from jax.experimental import pallas as pl
from jax.experimental.pallas import tpu as pltpu


# Rows masked to this value drop out of every softmax / CE term exactly
# (exp(fill - max) underflows to 0 for real rows; fully-filled rows give
# uniform softmax and contribute exactly 0 to the folded KL form).
_NEG_FILL = -1e9


def _round_up(x, m):
    return ((x + m - 1) // m) * m


def _cdiv(a, b):
    return (a + b - 1) // b


def _pow_int(x, n):
    """x ** n (integer n >= 1) via repeated squaring with plain VPU multiplies."""
    acc = None
    base = x
    while n:
        if n & 1:
            acc = base if acc is None else acc * base
        n >>= 1
        if n:
            base = base * base
    return acc


def _vmem_capacity_bytes():
    try:
        return int(pltpu.get_tpu_info().vmem_capacity_bytes)
    except Exception:
        return 64 << 20  # conservative fallback: v7x per-TensorCore VMEM


def _kd_partial_kernel(out_s_ref, out_t_ref, target_ref,   # inputs
                       kd_ref, ce_ref,                      # per-core partial sums
                       *, T, n_rows, n_blocks, mask_rows):
    c = pl.program_id(0)          # core / parallel axis
    i = pl.program_id(1)          # batch-tile reduction axis
    steps = pl.num_programs(1)

    # ---- init this core's resident accumulators on its first step -----------
    @pl.when(i == 0)
    def _init():
        kd_ref[...] = jnp.zeros_like(kd_ref)
        ce_ref[...] = jnp.zeros_like(ce_ref)

    s = out_s_ref[...].astype(jnp.float32)       # [TB, C] student logits
    t = out_t_ref[...].astype(jnp.float32)       # [TB, C] teacher logits
    TB, C = s.shape

    if mask_rows:
        raw_blk = c * steps + i
        blk = jnp.minimum(raw_blk, n_blocks - 1)             # matches index_map clamp
        row_ids = blk * TB + jax.lax.broadcasted_iota(jnp.int32, (TB, 1), 0)
        valid = (row_ids < n_rows) & (raw_blk < n_blocks)     # [TB, 1] bool
        valid_f = valid.astype(jnp.float32)
        # Mask the *loaded* values before any exp/reduction so out-of-bounds
        # garbage (possible Inf/NaN) never reaches the accumulators.
        s = jnp.where(valid, s, jnp.float32(_NEG_FILL))
        t = jnp.where(valid, t, jnp.float32(_NEG_FILL))

    inv_T = jnp.float32(1.0 / T)

    # ---- student tempered log-softmax pieces (row max shared with raw CE) ---
    s_max = jnp.max(s, axis=1, keepdims=True)                 # [TB, 1]
    s_c = s - s_max                                           # [TB, C]
    s_shift_T = s_c * inv_T
    s_exp_T = jnp.exp(s_shift_T)
    s_lse_T = jnp.log(jnp.sum(s_exp_T, axis=1, keepdims=True))  # [TB, 1]

    # ---- teacher tempered softmax pieces -------------------------------------
    t_max = jnp.max(t, axis=1, keepdims=True)
    t_shift_T = (t - t_max) * inv_T
    t_exp = jnp.exp(t_shift_T)
    t_sum = jnp.sum(t_exp, axis=1, keepdims=True)             # [TB, 1]
    log_t_sum = jnp.log(t_sum)
    inv_t_sum = pl.reciprocal(t_sum)                          # exact, one per row
    if mask_rows:
        inv_t_sum = inv_t_sum * valid_f                       # p_t -> 0 on padded rows

    p_t = t_exp * inv_t_sum                                   # softmax(out_t / T)
    # kl = p_t * (log_p_t - log_p_s) with both per-row [TB,1] log-sum terms
    # folded into one broadcast add; log_p_t / log_p_s never materialize.
    kl = p_t * ((t_shift_T - s_shift_T) + (s_lse_T - log_t_sum))
    kd_ref[...] += jnp.sum(kl, axis=0, keepdims=True)         # [1, C] running class sums

    # ---- cross entropy on raw student logits ---------------------------------
    # -log_softmax(s)[y] = log(sum exp(s - max)) - (s[y] - max)
    T_int = int(round(T))
    if abs(T - T_int) < 1e-9 and 1 <= T_int <= 8:
        # exp(s_c) == exp(s_c / T) ** T exactly: reuse s_exp_T, skip a full exp.
        s_exp_raw = _pow_int(s_exp_T, T_int)
    else:
        s_exp_raw = jnp.exp(s_c)
    lse_raw = jnp.log(jnp.sum(s_exp_raw, axis=1, keepdims=True))   # [TB, 1]
    tgt = target_ref[...]                                          # [TB, 1] int32
    col_ids = jax.lax.broadcasted_iota(jnp.int32, (TB, C), 1)
    s_tgt_c = jnp.sum(jnp.where(col_ids == tgt, s_c, 0.0),
                      axis=1, keepdims=True)                       # [TB, 1]
    ce_rows = lse_raw - s_tgt_c
    if mask_rows:
        ce_rows = ce_rows * valid_f
    ce_ref[...] += jnp.sum(ce_rows, axis=0, keepdims=True)         # (1, 1)


class KDLoss:
    """JAX/Pallas port of the PyTorch KDLoss module (weight=None case)."""

    def __init__(self, cls_num_list, T, weight=None):
        self.T = float(T)
        self.weight = weight  # TODO(synk): per-class CE weights not supported.
        cls_num_list = np.asarray(cls_num_list, dtype=np.float32)
        # class_freq is stored by the PyTorch module but unused in forward().
        self.class_freq = jnp.asarray(cls_num_list / np.sum(cls_num_list))

    def __call__(self, out_s, out_t, target, alpha, *, block_rows=None):
        B, C = out_s.shape
        itemsize = jnp.dtype(out_s.dtype).itemsize
        C_lane = _round_up(C, 128)        # lane footprint of one row inside VMEM

        # --- VMEM-aware batch-tile sizing ------------------------------------
        vmem_cap = _vmem_capacity_bytes()
        budget = min(vmem_cap // 2, 48 << 20)     # ~32 MiB on v7x, 48 MiB on v5e/v6e
        K_LIVE = 14                               # live [TB, C] f32 temporaries in the body
        per_row = C_lane * (2 * 2 * itemsize + K_LIVE * 4) + 1024
        tb_cap = max(8, (budget // per_row) // 8 * 8)

        if B < 8:
            TB = B                                # block == full batch dim
        else:
            want = 512 if block_rows is None else max(8, int(block_rows))
            TB = max(8, min(_round_up(min(want, B), 8), tb_cap))

        n_blocks = _cdiv(B, TB)
        num_cores = 2 if n_blocks >= 2 else 1     # v7x: 2 TCs; plain loop on v5e/v6e
        steps = _cdiv(n_blocks, num_cores)
        mask_rows = (TB * n_blocks != B) or (num_cores * steps != n_blocks)

        target2d = target.astype(jnp.int32).reshape(B, 1)

        def tile_map(c, i):
            # Clamp fully out-of-range steps onto the last real block; their
            # rows are masked off inside the kernel, so the only cost is one
            # redundant DMA on at most (num_cores - 1) steps.
            return (jnp.minimum(c * steps + i, n_blocks - 1), 0)

        est = TB * per_row + 8 * C_lane * 4 + (1 << 20)
        vmem_limit = int(min(max(est, 16 << 20), vmem_cap))

        cost = pl.CostEstimate(
            flops=int(14 * B * C_lane),
            transcendentals=int(3 * B * C_lane),
            bytes_accessed=int(2 * B * C * itemsize + B * 4
                               + num_cores * (C + 1) * 4),
        )

        kernel = functools.partial(
            _kd_partial_kernel, T=self.T, n_rows=B, n_blocks=n_blocks,
            mask_rows=mask_rows)

        kd_part, ce_part = pl.pallas_call(
            kernel,
            grid=(num_cores, steps),
            in_specs=[
                pl.BlockSpec((TB, C), tile_map),          # out_s
                pl.BlockSpec((TB, C), tile_map),          # out_t
                pl.BlockSpec((TB, 1), tile_map),          # target
            ],
            out_specs=(
                pl.BlockSpec((None, 1, C), lambda c, i: (c, 0, 0)),   # kd partials
                pl.BlockSpec((None, 1, 1), lambda c, i: (c, 0, 0)),   # ce partials
            ),
            out_shape=(
                jax.ShapeDtypeStruct((num_cores, 1, C), jnp.float32),
                jax.ShapeDtypeStruct((num_cores, 1, 1), jnp.float32),
            ),
            compiler_params=pltpu.CompilerParams(
                dimension_semantics=("parallel", "arbitrary"),
                vmem_limit_bytes=vmem_limit,
            ),
            cost_estimate=cost,
        )(out_s, out_t, target2d)

        # --- O(C) epilogue: combine per-core partial sums ---------------------
        Tf = jnp.float32(self.T)
        inv_B = jnp.float32(1.0 / B)
        kd_sum = jnp.sum(kd_part, axis=0)[0]               # [C] per-class KL sums
        kd = kd_sum * inv_B                                # KL(...).mean(dim=0)
        kd_loss = jnp.sum(kd_sum) * inv_B * Tf * Tf        # 'batchmean' * T^2
        ce_loss = jnp.sum(ce_part) * inv_B
        alpha_f = jnp.asarray(alpha, dtype=jnp.float32)
        loss = alpha_f * kd_loss + ce_loss
        return loss, kd


def _reference(out_s, out_t, target, alpha, T):
    """Pure-JAX reference mirroring the PyTorch forward, for sanity checking."""
    out_s = out_s.astype(jnp.float32)
    out_t = out_t.astype(jnp.float32)
    log_p_s = jax.nn.log_softmax(out_s / T, axis=1)
    p_t = jax.nn.softmax(out_t / T, axis=1)
    log_p_t = jax.nn.log_softmax(out_t / T, axis=1)
    kl = p_t * (log_p_t - log_p_s)
    kd = kl.mean(axis=0)
    kd_loss = kl.sum() / out_s.shape[0] * T * T
    log_p = jax.nn.log_softmax(out_s, axis=1)
    ce = -jnp.take_along_axis(log_p, target[:, None], axis=1).mean()
    return alpha * kd_loss + ce, kd


if __name__ == "__main__":
    key = jax.random.PRNGKey(0)
    T = 4.0
    alpha = 0.5
    ks = jax.random.split(key, 9)

    cases = []

    # Case 1: aligned shapes -> single block, no masking.
    B1, C1 = 16, 128
    s1 = jax.random.normal(ks[0], (B1, C1), dtype=jnp.float32)
    t1 = jax.random.normal(ks[1], (B1, C1), dtype=jnp.float32)
    y1 = jax.random.randint(ks[2], (B1,), 0, C1, dtype=jnp.int32)
    cases.append((s1, t1, y1, None))

    # Case 2: ragged B and C; block_rows=8 forces the 2-way core split, a
    # partially-valid last tile, and one fully out-of-range (clamped) step.
    B2, C2 = 20, 100
    s2 = jax.random.normal(ks[3], (B2, C2), dtype=jnp.float32)
    t2 = jax.random.normal(ks[4], (B2, C2), dtype=jnp.float32)
    y2 = jax.random.randint(ks[5], (B2,), 0, C2, dtype=jnp.int32)
    cases.append((s2, t2, y2, 8))

    # Case 3: tiny batch (< 8 rows) + caller-provided bf16 logits.
    B3, C3 = 5, 32
    s3 = jax.random.normal(ks[6], (B3, C3), dtype=jnp.float32).astype(jnp.bfloat16)
    t3 = jax.random.normal(ks[7], (B3, C3), dtype=jnp.float32).astype(jnp.bfloat16)
    y3 = jax.random.randint(ks[8], (B3,), 0, C3, dtype=jnp.int32)
    cases.append((s3, t3, y3, None))

    for (s, t, y, br) in cases:
        mod = KDLoss(np.arange(1, s.shape[1] + 1, dtype=np.float32), T)
        loss, kd = mod(s, t, y, alpha, block_rows=br)
        jax.block_until_ready((loss, kd))
        ref_loss, ref_kd = _reference(s, t, y, alpha, T)
        assert jnp.allclose(loss, ref_loss, rtol=2e-3, atol=1e-4), (loss, ref_loss)
        assert jnp.allclose(kd, ref_kd, rtol=2e-3, atol=1e-4), (kd, ref_kd)

    print("KERNEL_OK")
</pallas_src>

<mosaic_0001>
module attributes {stable_mosaic.version = 11 : i64} {
  func.func @_kd_partial_kernel(%arg0: i32, %arg1: i32, %arg2: memref<16x128xf32, #tpu.memory_space<vmem>>, %arg3: memref<16x128xf32, #tpu.memory_space<vmem>>, %arg4: memref<16x1xi32, #tpu.memory_space<vmem>>, %arg5: memref<1x1x128xf32, #tpu.memory_space<vmem>>, %arg6: memref<1x1x1xf32, #tpu.memory_space<vmem>>) attributes {dimension_semantics = [#tpu.dimension_semantics<parallel>, #tpu.dimension_semantics<arbitrary>], iteration_bounds = array<i64: 1, 1>, scalar_prefetch = 0 : i64, scratch_operands = 0 : i64, tpu.core_type = #tpu.core_type<tc>, window_params = [{transform_indices = @transform_0, window_bounds = array<i64: 16, 128>}, {transform_indices = @transform_1, window_bounds = array<i64: 16, 128>}, {transform_indices = @transform_2, window_bounds = array<i64: 16, 1>}, {transform_indices = @transform_3, window_bounds = array<i64: 1, 1, 128>}, {transform_indices = @transform_4, window_bounds = array<i64: 1, 1, 1>}]} {
    %c0_i32 = arith.constant 0 : i32
    %0 = arith.cmpi eq, %arg1, %c0_i32 : i32
    %1 = arith.extui %0 : i1 to i32
    %c0_i32_0 = arith.constant 0 : i32
    %2 = arith.cmpi ne, %1, %c0_i32_0 : i32
    scf.if %2 {
      %cst_28 = arith.constant 0.000000e+00 : f32
      %63 = vector.broadcast %cst_28 : f32 to vector<1x128xf32>
      %c0_29 = arith.constant 0 : index
      %c0_30 = arith.constant 0 : index
      %c0_31 = arith.constant 0 : index
      %64 = vector.load %arg5[%c0_29, %c0_30, %c0_31] : memref<1x1x128xf32, #tpu.memory_space<vmem>>, vector<1x1x128xf32>
      %65 = vector.shape_cast %64 : vector<1x1x128xf32> to vector<1x128xf32>
      %66 = vector.shape_cast %63 : vector<1x128xf32> to vector<1x1x128xf32>
      tpu.vector_store %arg5[%c0_29, %c0_30, %c0_31], %66 {strides = array<i32>} : memref<1x1x128xf32, #tpu.memory_space<vmem>>, vector<1x1x128xf32>,
      %cst_32 = arith.constant 0.000000e+00 : f32
      %67 = vector.broadcast %cst_32 : f32 to vector<1x1xf32>
      %c0_33 = arith.constant 0 : index
      %c0_34 = arith.constant 0 : index
      %c0_35 = arith.constant 0 : index
      %68 = vector.load %arg6[%c0_33, %c0_34, %c0_35] : memref<1x1x1xf32, #tpu.memory_space<vmem>>, vector<1x1x1xf32>
      %69 = vector.shape_cast %68 : vector<1x1x1xf32> to vector<1x1xf32>
      %70 = vector.shape_cast %67 : vector<1x1xf32> to vector<1x1x1xf32>
      tpu.vector_store %arg6[%c0_33, %c0_34, %c0_35], %70 {strides = array<i32>} : memref<1x1x1xf32, #tpu.memory_space<vmem>>, vector<1x1x1xf32>,
    } else {
    }
    %c0 = arith.constant 0 : index
    %c0_1 = arith.constant 0 : index
    %3 = vector.load %arg2[%c0, %c0_1] : memref<16x128xf32, #tpu.memory_space<vmem>>, vector<16x128xf32>
    %c0_2 = arith.constant 0 : index
    %c0_3 = arith.constant 0 : index
    %4 = vector.load %arg3[%c0_2, %c0_3] : memref<16x128xf32, #tpu.memory_space<vmem>>, vector<16x128xf32>
    %cst = arith.constant dense<0xFF800000> : vector<16xf32>
    %5 = vector.multi_reduction <maximumf>, %3, %cst [1] : vector<16x128xf32> to vector<16xf32>
    %6 = vector.shape_cast %5 : vector<16xf32> to vector<16x1xf32>
    %7 = vector.broadcast %6 : vector<16x1xf32> to vector<16x128xf32>
    %8 = arith.subf %3, %7 : vector<16x128xf32>
    %cst_4 = arith.constant 2.500000e-01 : f32
    %9 = vector.broadcast %cst_4 : f32 to vector<16x128xf32>
    %10 = arith.mulf %8, %9 : vector<16x128xf32>
    %11 = math.exp %10 : vector<16x128xf32>
    %cst_5 = arith.constant dense<0.000000e+00> : vector<16xf32>
    %12 = vector.multi_reduction <add>, %11, %cst_5 [1] : vector<16x128xf32> to vector<16xf32>
    %13 = vector.shape_cast %12 : vector<16xf32> to vector<16x1xf32>
    %14 = math.log %13 : vector<16x1xf32>
    %cst_6 = arith.constant dense<0xFF800000> : vector<16xf32>
    %15 = vector.multi_reduction <maximumf>, %4, %cst_6 [1] : vector<16x128xf32> to vector<16xf32>
    %16 = vector.shape_cast %15 : vector<16xf32> to vector<16x1xf32>
    %17 = vector.broadcast %16 : vector<16x1xf32> to vector<16x128xf32>
    %18 = arith.subf %4, %17 : vector<16x128xf32>
    %cst_7 = arith.constant 2.500000e-01 : f32
    %19 = vector.broadcast %cst_7 : f32 to vector<16x128xf32>
    %20 = arith.mulf %18, %19 : vector<16x128xf32>
    %21 = math.exp %20 : vector<16x128xf32>
    %cst_8 = arith.constant dense<0.000000e+00> : vector<16xf32>
    %22 = vector.multi_reduction <add>, %21, %cst_8 [1] : vector<16x128xf32> to vector<16xf32>
    %23 = vector.shape_cast %22 : vector<16xf32> to vector<16x1xf32>
    %24 = math.log %23 : vector<16x1xf32>
    %25 = tpu.reciprocal %23 : vector<16x1xf32> -> vector<16x1xf32>
    %26 = vector.broadcast %25 : vector<16x1xf32> to vector<16x128xf32>
    %27 = arith.mulf %21, %26 : vector<16x128xf32>
    %28 = arith.subf %20, %10 : vector<16x128xf32>
    %29 = arith.subf %14, %24 : vector<16x1xf32>
    %30 = vector.broadcast %29 : vector<16x1xf32> to vector<16x128xf32>
    %31 = arith.addf %28, %30 : vector<16x128xf32>
    %32 = arith.mulf %27, %31 : vector<16x128xf32>
    %c0_9 = arith.constant 0 : index
    %c0_10 = arith.constant 0 : index
    %c0_11 = arith.constant 0 : index
    %33 = vector.load %arg5[%c0_9, %c0_10, %c0_11] : memref<1x1x128xf32, #tpu.memory_space<vmem>>, vector<1x1x128xf32>
    %34 = vector.shape_cast %33 : vector<1x1x128xf32> to vector<1x128xf32>
    %cst_12 = arith.constant dense<0.000000e+00> : vector<128xf32>
    %35 = vector.multi_reduction <add>, %32, %cst_12 [0] : vector<16x128xf32> to vector<128xf32>
    %36 = vector.shape_cast %35 : vector<128xf32> to vector<1x128xf32>
    %37 = arith.addf %34, %36 : vector<1x128xf32>
    %c0_13 = arith.constant 0 : index
    %c0_14 = arith.constant 0 : index
    %c0_15 = arith.constant 0 : index
    %38 = vector.load %arg5[%c0_13, %c0_14, %c0_15] : memref<1x1x128xf32, #tpu.memory_space<vmem>>, vector<1x1x128xf32>
    %39 = vector.shape_cast %38 : vector<1x1x128xf32> to vector<1x128xf32>
    %40 = vector.shape_cast %37 : vector<1x128xf32> to vector<1x1x128xf32>
    tpu.vector_store %arg5[%c0_13, %c0_14, %c0_15], %40 {strides = array<i32>} : memref<1x1x128xf32, #tpu.memory_space<vmem>>, vector<1x1x128xf32>,
    %41 = arith.mulf %11, %11 : vector<16x128xf32>
    %42 = arith.mulf %41, %41 : vector<16x128xf32>
    %cst_16 = arith.constant dense<0.000000e+00> : vector<16xf32>
    %43 = vector.multi_reduction <add>, %42, %cst_16 [1] : vector<16x128xf32> to vector<16xf32>
    %44 = vector.shape_cast %43 : vector<16xf32> to vector<16x1xf32>
    %45 = math.log %44 : vector<16x1xf32>
    %c0_17 = arith.constant 0 : index
    %c0_18 = arith.constant 0 : index
    %46 = vector.load %arg4[%c0_17, %c0_18] : memref<16x1xi32, #tpu.memory_space<vmem>>, vector<16x1xi32>
    %47 = tpu.iota {dimensions = array<i32: 1>} : vector<16x128xi32>
    %48 = vector.broadcast %46 : vector<16x1xi32> to vector<16x128xi32>
    %49 = arith.cmpi eq, %47, %48 : vector<16x128xi32>
    %cst_19 = arith.constant 0.000000e+00 : f32
    %50 = vector.broadcast %cst_19 : f32 to vector<16x128xf32>
    %51 = arith.select %49, %8, %50 : vector<16x128xi1>, vector<16x128xf32>
    %cst_20 = arith.constant dense<0.000000e+00> : vector<16xf32>
    %52 = vector.multi_reduction <add>, %51, %cst_20 [1] : vector<16x128xf32> to vector<16xf32>
    %53 = vector.shape_cast %52 : vector<16xf32> to vector<16x1xf32>
    %54 = arith.subf %45, %53 : vector<16x1xf32>
    %c0_21 = arith.constant 0 : index
    %c0_22 = arith.constant 0 : index
    %c0_23 = arith.constant 0 : index
    %55 = vector.load %arg6[%c0_21, %c0_22, %c0_23] : memref<1x1x1xf32, #tpu.memory_space<vmem>>, vector<1x1x1xf32>
    %56 = vector.shape_cast %55 : vector<1x1x1xf32> to vector<1x1xf32>
    %cst_24 = arith.constant dense<0.000000e+00> : vector<1xf32>
    %57 = vector.multi_reduction <add>, %54, %cst_24 [0] : vector<16x1xf32> to vector<1xf32>
    %58 = vector.shape_cast %57 : vector<1xf32> to vector<1x1xf32>
    %59 = arith.addf %56, %58 : vector<1x1xf32>
    %c0_25 = arith.constant 0 : index
    %c0_26 = arith.constant 0 : index
    %c0_27 = arith.constant 0 : index
    %60 = vector.load %arg6[%c0_25, %c0_26, %c0_27] : memref<1x1x1xf32, #tpu.memory_space<vmem>>, vector<1x1x1xf32>
    %61 = vector.shape_cast %60 : vector<1x1x1xf32> to vector<1x1xf32>
    %62 = vector.shape_cast %59 : vector<1x1xf32> to vector<1x1x1xf32>
    tpu.vector_store %arg6[%c0_25, %c0_26, %c0_27], %62 {strides = array<i32>} : memref<1x1x1xf32, #tpu.memory_space<vmem>>, vector<1x1x1xf32>,
    return
  }
  func.func @transform_0(%arg0: i32, %arg1: i32) -> (i32, i32) {
    %c1_i32 = arith.constant 1 : i32
    %0 = arith.muli %arg0, %c1_i32 : i32
    %1 = arith.addi %0, %arg1 : i32
    %c0_i32 = arith.constant 0 : i32
    %2 = arith.minsi %1, %c0_i32 : i32
    %c0_i32_0 = arith.constant 0 : i32
    %c0_i32_1 = arith.constant 0 : i32
    return %2, %c0_i32_0 : i32, i32
  }
  func.func @transform_1(%arg0: i32, %arg1: i32) -> (i32, i32) {
    %c1_i32 = arith.constant 1 : i32
    %0 = arith.muli %arg0, %c1_i32 : i32
    %1 = arith.addi %0, %arg1 : i32
    %c0_i32 = arith.constant 0 : i32
    %2 = arith.minsi %1, %c0_i32 : i32
    %c0_i32_0 = arith.constant 0 : i32
    %c0_i32_1 = arith.constant 0 : i32
    return %2, %c0_i32_0 : i32, i32
  }
  func.func @transform_2(%arg0: i32, %arg1: i32) -> (i32, i32) {
    %c1_i32 = arith.constant 1 : i32
    %0 = arith.muli %arg0, %c1_i32 : i32
    %1 = arith.addi %0, %arg1 : i32
    %c0_i32 = arith.constant 0 : i32
    %2 = arith.minsi %1, %c0_i32 : i32
    %c0_i32_0 = arith.constant 0 : i32
    %c0_i32_1 = arith.constant 0 : i32
    return %2, %c0_i32_0 : i32, i32
  }
  func.func @transform_3(%arg0: i32, %arg1: i32) -> (i32, i32, i32) {
    %c0_i32 = arith.constant 0 : i32
    %c0_i32_0 = arith.constant 0 : i32
    %c0_i32_1 = arith.constant 0 : i32
    return %arg0, %c0_i32, %c0_i32_0 : i32, i32, i32
  }
  func.func @transform_4(%arg0: i32, %arg1: i32) -> (i32, i32, i32) {
    %c0_i32 = arith.constant 0 : i32
    %c0_i32_0 = arith.constant 0 : i32
    %c0_i32_1 = arith.constant 0 : i32
    return %arg0, %c0_i32, %c0_i32_0 : i32, i32, i32
  }
}

</mosaic_0001>

<bundles_post_ra>
// kernel: tpu_custom_call.1
= control target key start
LH: loop header
LB: loop body
LE: loop exit
PB: predicated region body
PF: predicated region fallthrough
CT: control target
= control target key end

     0   :  { %10 = vsyncpa [#allocation3], 0  ;;  %s438_s0 = inlined_call_operand.vmem [shape: f32[16,128], index: 0, kind: input, shape index: {}]   ;;  %s439_s1 = inlined_call_operand.hbm [shape: f32[16,128], index: 1, kind: input, shape index: {}]   ;;  %s440_s2 = inlined_call_operand.vmem [shape: s32[16,1], index: 2, kind: input, shape index: {}]   ;;  %s441_s3 = inlined_call_operand.hbm [shape: f32[1,1,128], index: 3, kind: output, shape index: {0}]   ;;  %s442_s4 = inlined_call_operand.hbm [shape: f32[1,1,1], index: 4, kind: output, shape index: {1}]  }
   0x1   :  { %11 = vsyncpa [#allocation4], 0 }
   0x2   :  { %12 = vsyncpa [#allocation7], 0  ;;  %s364_s15 = smov [#allocation2]  }
   0x3   :  { %s38_s16 = sshll.u32 %s364_s15, 4  ;;  %s39_s16 = int_to_ptr.vmem [resolvable:$true] %s38_s16 }
   0x4   :  { %s306_s17 = scalar_lea.vmem %s39_s16, 256  ;;  %p311_p1 = scmp.lt.s32.totalorder %s39_s16, %s39_s16 }
   0x5   :  { %p307_p0 = scmp.ne.s32.totalorder %s39_s16, %s306_s17  ;;  %p312_p2 = scmp.lt.s32.totalorder %s306_s17, %s306_s17 }
   0x7   :  { %p313_p3 = por %p312_p2, %p311_p1 }
   0x9   :  { %p314_p4 = pnand %p313_p3, %p307_p0 }
   0xb   :  { %317 = shalt.err (!%p314_p4)
}
   0xc   :  { %s365_s18 = smov 128   ;;  %s366_s19 = smov 8  }
   0xd   :  { %44 = dma.hbm_to_vmem [thread:$0]  %s439_s1, 256, %s39_s16, [#allocation3], %s365_s18, %s365_s18, %s366_s19  }
   0xe   :  { %358 = dma.done.wait [#allocation3], 256  }
   0xf   :  { %359 = vsyncadd [#allocation3], 4294967040  ;;  %v367_v0 = vmov 0   ;;  %v115_v1 = vld [vmem:[#allocation2] sm:$0xff]  ;;  %v114_v3 = vld [vmem:[%s438_s0 + $0x8] sm:$0xff]  ;;  %v193_v30 = vlaneseq  ;;  %v368_v39 = vmov 0.0  }
  0x10   :  { %272 = vset.pattern.permute.xlu0 %v367_v0  ;;  %273 = vset.pattern.permute.xlu1 %v367_v0  ;;  %v113_v2 = vld [vmem:[%s438_s0] sm:$0xff]  ;;  %v116_v4 = vld [vmem:[#allocation2 + $0x8] sm:$0xff]  ;;  %110 = vst [vmem:[#allocation5] sm:$0x1] %v368_v39  ;;  %vm111_vm2 = vcmask 0   ;;  %s369_s0 = smov [#allocation5]  }
  0x11   :  { %137 = vmax.xlane.f32.xlu1 %v115_v1  ;;  %117 = vmax.xlane.f32.xlu0 %v113_v2  ;;  %v192_v5 = vld [vmem:[%s440_s2 + $0x8] sm:$0xff]  ;;  %v191_v6 = vld [vmem:[%s440_s2] sm:$0xff]  ;;  %v194_v33 = vand.u32 127, %v193_v30  ;;  %112 = vst.msk [vmem:[#allocation6] sm:$0x1] %vm111_vm2, %v368_v39  ;;  %s228_s2 = sshll.u32 %s369_s0, 4  ;;  %s229_s2 = int_to_ptr.vmem [resolvable:$true] %s228_s2 }
  0x12   :  { %s370_s29 = smov [#allocation6]   ;;  %s318_s5 = scalar_lea.vmem %s229_s2, 16 }
  0x13   :  { %s238_s30 = sshll.u32 %s370_s29, 4  ;;  %p319_p5 = scmp.ne.s32.totalorder %s229_s2, %s318_s5  ;;  %s239_s30 = int_to_ptr.vmem [resolvable:$true] %s238_s30 }
  0x14   :  { %s322_s6 = scalar_lea.vmem %s229_s2, 32  ;;  %p323_p6 = scmp.lt.s32.totalorder %s229_s2, %s229_s2 }
  0x15   :  { %119 = vmax.xlane.f32.xlu0 %v114_v3  ;;  %139 = vmax.xlane.f32.xlu1 %v116_v4  ;;  %p324_p7 = scmp.lt.s32.totalorder %s322_s6, %s318_s5 }
  0x17   :  { %p325_p8 = por %p324_p7, %p323_p6 }
  0x19   :  { %p326_p9 = pnand %p325_p8, %p319_p5 }
  0x26   :  { %199 = vperm.xlu1 %273, %v192_v5  }
  0x2b   :  { %196 = vperm.xlu0 %272, %v191_v6  }
  0x9a   :  { %v138_v7 = vpop.xlane.xlu1 %137  ;;  %v118_v8 = vpop.xlane.xlu0 %117 }
  0x9b   :  { %v141_v9 = vsub.f32 %v115_v1, %v138_v7  ;;  %v121_v10 = vsub.f32 %v113_v2, %v118_v8 }
  0x9d   :  { %v411_v11 = vmul.f32 0.25, %v141_v9  ;;  %v413_v12 = vmul.f32 0.25, %v121_v10 }
  0x9e   :  { %v140_v13 = vpop.xlane.xlu1 %139  ;;  %v120_v14 = vpop.xlane.xlu0 %119 }
  0x9f   :  { %v125_v15 = vmul.f32 1.442695, %v413_v12  ;;  %v161_v16 = vsub.f32 %v411_v11, %v413_v12  ;;  %v142_v17 = vsub.f32 %v116_v4, %v140_v13  ;;  %v145_v18 = vmul.f32 1.442695, %v411_v11 }
  0xa0   :  { %v122_v19 = vsub.f32 %v114_v3, %v120_v14 }
  0xa1   :  { %v419_v20 = vmul.f32 0.25, %v142_v17  ;;  %274 = vpow2.f32 %v125_v15 }
  0xa2   :  { %v421_v21 = vmul.f32 0.25, %v122_v19  ;;  %276 = vpow2.f32 %v145_v18  ;;  %v200_v36 = vpop.permute.xlu1 %199  ;;  %v169_v18 = vld [vmem:[#allocation5] sm:$0x1] }
  0xa3   :  { %v147_v22 = vmul.f32 1.442695, %v419_v20  ;;  %vm202_vm1 = vcmp.eq.s32.totalorder %v194_v33, %v200_v36 }
  0xa4   :  { %v127_v23 = vmul.f32 1.442695, %v421_v21  ;;  %v162_v24 = vsub.f32 %v419_v20, %v421_v21  ;;  %v204_v38 = vsel %vm202_vm1, %v122_v19, 0.0 }
  0xa6   :  { %278 = vpow2.f32 %v127_v23  ;;  %v197_v35 = vpop.permute.xlu0 %196  ;;  %v211_v23 = vld [vmem:[#allocation6] sm:$0x1] }
  0xa7   :  { %280 = vpow2.f32 %v147_v22  ;;  %vm201_vm0 = vcmp.eq.s32.totalorder %v194_v33, %v197_v35 }
  0xa8   :  { %v203_v37 = vsel %vm201_vm0, %v121_v10, 0.0 }
  0xae   :  { %v275_v25 = vpop.eup %274 }
  0xaf   :  { %129 = vadd.xlane.f32.xlu1 %v275_v25  ;;  %v277_v26 = vpop.eup %276  ;;  %v179_v29 = vmul.f32 %v275_v25, %v275_v25 }
  0xb1   :  { %v181_v32 = vmul.f32 %v179_v29, %v179_v29 }
  0xb3   :  { %v279_v27 = vpop.eup %278  ;;  %149 = vadd.xlane.f32.xlu1 %v277_v26 }
  0xb4   :  { %131 = vadd.xlane.f32.xlu0 %v279_v27  ;;  %v281_v28 = vpop.eup %280  ;;  %v180_v31 = vmul.f32 %v279_v27, %v279_v27 }
  0xb6   :  { %v182_v34 = vmul.f32 %v180_v31, %v180_v31 }
  0xb7   :  { %151 = vadd.xlane.f32.xlu1 %v281_v28 }
  0xbb   :  { %183 = vadd.xlane.f32.xlu1 %v181_v32 }
  0xbf   :  { %185 = vadd.xlane.f32.xlu1 %v182_v34 }
  0xc3   :  { %205 = vadd.xlane.f32.xlu1 %v203_v37 }
  0xc7   :  { %207 = vadd.xlane.f32.xlu1 %v204_v38 }
 0x138   :  { %v130_v40 = vpop.xlane.xlu1 %129 }
 0x139   :  { %282 = vlog2.f32 %v130_v40 }
 0x13c   :  { %v150_v41 = vpop.xlane.xlu1 %149 }
 0x13d   :  { %v132_v42 = vpop.xlane.xlu0 %131  ;;  %284 = vlog2.f32 %v150_v41 }
 0x13e   :  { %286 = vlog2.f32 %v132_v42 }
 0x140   :  { %v152_v43 = vpop.xlane.xlu1 %151 }
 0x141   :  { %288 = vlog2.f32 %v152_v43 }
 0x142   :  { %290 = vrcp.f32 %v150_v41 }
 0x143   :  { %292 = vrcp.f32 %v152_v43 }
 0x144   :  { %v184_v44 = vpop.xlane.xlu1 %183 }
 0x145   :  { %294 = vlog2.f32 %v184_v44 }
 0x146   :  { %v283_v45 = vpop.eup %282 }
 0x147   :  { %v134_v48 = vmul.f32 0.6931472, %v283_v45 }
 0x148   :  { %v186_v46 = vpop.xlane.xlu1 %185 }
 0x149   :  { %296 = vlog2.f32 %v186_v46 }
 0x14a   :  { %v285_v47 = vpop.eup %284 }
 0x14b   :  { %v154_v49 = vmul.f32 0.6931472, %v285_v47  ;;  %v287_v50 = vpop.eup %286 }
 0x14c   :  { %v136_v52 = vmul.f32 0.6931472, %v287_v50  ;;  %v206_v60 = vpop.xlane.xlu1 %205 }
 0x14d   :  { %v163_v51 = vsub.f32 %v134_v48, %v154_v49 }
 0x14e   :  { %v289_v53 = vpop.eup %288 }
 0x14f   :  { %v291_v54 = vpop.eup %290  ;;  %v156_v55 = vmul.f32 0.6931472, %v289_v53  ;;  %v165_v57 = vadd.f32 %v163_v51, %v161_v16 }
 0x150   :  { %v293_v56 = vpop.eup %292  ;;  %v159_v61 = vmul.f32 %v291_v54, %v277_v26  ;;  %v208_v6 = vpop.xlane.xlu1 %207 }
 0x151   :  { %v164_v58 = vsub.f32 %v136_v52, %v156_v55  ;;  %v160_v62 = vmul.f32 %v293_v56, %v281_v28 }
 0x152   :  { %v295_v59 = vpop.eup %294  ;;  %v167_v0 = vmul.f32 %v165_v57, %v159_v61 }
 0x153   :  { %v166_v63 = vadd.f32 %v164_v58, %v162_v24  ;;  %v188_v2 = vmul.f32 0.6931472, %v295_v59 }
 0x155   :  { %v168_v1 = vmul.f32 %v166_v63, %v160_v62  ;;  %v209_v8 = vsub.f32 %v188_v2, %v206_v60 }
 0x156   :  { %v297_v3 = vpop.eup %296 }
 0x157   :  { %v170_v4 = vadd.f32 %v168_v1, %v167_v0  ;;  %v190_v5 = vmul.f32 0.6931472, %v297_v3 }
 0x159   :  { %v171_v7 = vrot.slane %v170_v4, 4  ;;  %v210_v9 = vsub.f32 %v190_v5, %v208_v6 }
 0x15b   :  { %v212_v10 = vadd.f32 %v210_v9, %v209_v8  ;;  %v172_v13 = vadd.f32 %v171_v7, %v170_v4 }
 0x15d   :  { %v213_v11 = vrot.slane %v212_v10, 4  ;;  %v173_v12 = vrot.slane %v172_v13, 2 }
 0x15f   :  { %v214_v14 = vadd.f32 %v213_v11, %v212_v10  ;;  %v174_v15 = vadd.f32 %v173_v12, %v172_v13 }
 0x161   :  { %v215_v16 = vrot.slane %v214_v14, 2  ;;  %v175_v17 = vrot.slane %v174_v15, 1 }
 0x163   :  { %v216_v19 = vadd.f32 %v215_v16, %v214_v14  ;;  %v176_v20 = vadd.f32 %v175_v17, %v174_v15 }
 0x165   :  { %v217_v21 = vrot.slane %v216_v19, 1  ;;  %v177_v22 = vadd.f32 %v176_v20, %v169_v18 }
 0x167   :  { %v218_v24 = vadd.f32 %v217_v21, %v216_v19  ;;  %178 = vst [vmem:[#allocation5] sm:$0x1] %v177_v22 }
 0x168   :  { %329 = shalt.err (!%p326_p9)
}
 0x169   :  { %231 = dma.vmem_to_hbm [thread:$0]  %s229_s2, 16, %s441_s3, [#allocation4]   ;;  %v219_v25 = vadd.f32 %v218_v24, %v211_v23 }
 0x16a   :  { %s338_s9 = scalar_lea.vmem %s239_s30, 16  ;;  %s342_s10 = scalar_lea.vmem %s239_s30, 32 }
 0x16b   :  { %221 = vst.msk [vmem:[#allocation6] sm:$0x1] %vm111_vm2, %v219_v25  ;;  %p339_p10 = scmp.ne.s32.totalorder %s239_s30, %s338_s9  ;;  %p343_p11 = scmp.lt.s32.totalorder %s239_s30, %s239_s30 }
 0x16c   :  { %p344_p12 = scmp.lt.s32.totalorder %s342_s10, %s338_s9 }
 0x16e   :  { %p345_p13 = por %p344_p12, %p343_p11 }
 0x170   :  { %p346_p0 = pnand %p345_p13, %p339_p10 }
 0x172   :  { %349 = shalt.err (!%p346_p0)
}
 0x173   :  { %241 = dma.vmem_to_hbm [thread:$0]  %s239_s30, 16, %s442_s4, [#allocation7]  }
 0x174   :  { %360 = dma.done.wait [#allocation4], 16  }
 0x175   :  { %361 = vsyncadd [#allocation4], 4294967280 }
 0x176   :  { %362 = dma.done.wait [#allocation7], 16  }
 0x177   :  { %363 = vsyncadd [#allocation7], 4294967280 }
 0x178   :  { %248 = vsyncpa [#allocation3], 1 }
 0x179   :  { %249 = vsyncpa [#allocation4], 1 }
 0x17a   :  { %250 = vsyncpa [#allocation7], 1 }

</bundles_post_ra>
